<compile_context>
chip_gen: v5e
topology: v5e:2x2
jax: 0.10.0
libtpu: 0.0.40
codegen_flags: <defaults>
</compile_context>

<pallas_src>
import math

import jax
import jax.numpy as jnp
from jax.experimental import pallas as pl
from jax.experimental.pallas import tpu as pltpu


def make_sinusoidal_encoding(d_model: int, max_len: int) -> jnp.ndarray:
    """Sinusoidal table, identical to the PyTorch _PositionalEncoder init (even d_model)."""
    assert d_model % 2 == 0, "sinusoidal table (like the PyTorch original) requires even d_model"
    position = jnp.arange(max_len, dtype=jnp.float32)[:, None]                   # (max_len, 1)
    div_term = jnp.exp(
        jnp.arange(0, d_model, 2, dtype=jnp.float32) * (-math.log(10000.0) / d_model)
    )                                                                            # (d_model//2,)
    angles = position * div_term                                                 # (max_len, d_model//2)
    enc = jnp.zeros((max_len, d_model), dtype=jnp.float32)
    enc = enc.at[:, 0::2].set(jnp.sin(angles))
    enc = enc.at[:, 1::2].set(jnp.cos(angles))
    return enc


def _fused_linear_posenc_kernel(x_ref, w_ref, e_ref, o_ref):
    # One (rows, K) tile of inputs -> one (rows, N) tile of outputs.
    #   x_ref (tr, K)  input rows (native dtype, no up-cast)
    #   w_ref (K, N)   (block-diagonal) transposed weight, resident across batch
    #   e_ref (tr, N)  bias + positional encoding rows (f32), resident across batch
    #   o_ref (tr, N)  output rows
    y = jnp.dot(x_ref[...], w_ref[...], preferred_element_type=jnp.float32)
    o_ref[...] = (y + e_ref[...]).astype(o_ref.dtype)


def linear_positional_encoder(x, weight, bias, encoding, *, row_tile=1024,
                              vmem_budget_bytes=12 * 1024 * 1024):
    """Fused  y = x @ weight.T + bias + encoding[:S]  (PyTorch Linear + _PositionalEncoder).

    x: (B, S, F);  weight: (D, F) [PyTorch layout];  bias: (D,);  encoding: (max_len, D)
    Returns (B, S, D) in x.dtype.
    """
    B, S, F = x.shape
    D, F2 = weight.shape
    assert F2 == F
    assert bias.shape == (D,)
    assert encoding.shape[0] >= S and encoding.shape[1] == D
    assert row_tile >= 8
    out_dtype = x.dtype

    # Fold the bias into the (tiny, trace-time) positional-encoding table.
    enc_b = encoding[:S].astype(jnp.float32) + bias.astype(jnp.float32)[None, :]  # (S, D)
    w_t = weight.T.astype(x.dtype)                                                # (F, D)

    # Lane-dense packing: group P consecutive sequence rows into one 128-lane
    # output row via a block-diagonal weight.  All reshapes below keep the
    # row-major element order (bitcasts), so no extra HBM passes are added.
    if 0 < D < 128 and 128 % D == 0 and S % (128 // D) == 0:
        P = 128 // D
    else:
        P = 1                                   # plain path: D is the full last dim

    K, N = P * F, P * D
    R = S // P                                  # kernel-view rows per batch element
    if P > 1:
        x_k = x.reshape(B, R, K)                                   # contiguous reshape
        w_k = jnp.kron(jnp.eye(P, dtype=w_t.dtype), w_t)           # (K, N) block-diag
        e_k = enc_b.reshape(R, N)                                  # contiguous reshape
    else:
        x_k, w_k, e_k = x, w_t, enc_b

    # Row-tile from a VMEM budget: double-buffered x / enc / out + the resident
    # (but still double-buffered) weight must stay well under the scoped limit
    # on every generation (v5e 16 MiB, v6e 32 MiB, v7x 32 MiB scoped / 64 MiB).
    in_bytes = jnp.dtype(x.dtype).itemsize
    out_bytes = jnp.dtype(out_dtype).itemsize
    row_bytes = K * in_bytes + N * 4 + N * out_bytes
    budget_rows = max(8, (vmem_budget_bytes - 2 * K * N * in_bytes) // (2 * row_bytes))
    tr_cap = max(8, min(row_tile, budget_rows))
    if R <= tr_cap:
        tr = R                                   # single full-extent tile (always legal)
    else:
        tr = (tr_cap // 8) * 8                   # ragged last tile handled by masking
    n_s = pl.cdiv(R, tr)

    out = pl.pallas_call(
        _fused_linear_posenc_kernel,
        out_shape=jax.ShapeDtypeStruct((B, R, N), out_dtype),
        # Sequence tiles outer, batch inner: enc / weight block indices are
        # unchanged across consecutive steps, so they are not re-DMA'd per batch.
        grid=(n_s, B),
        in_specs=[
            pl.BlockSpec((pl.Squeezed(), tr, K), lambda s, b: (b, s, 0)),   # x rows
            pl.BlockSpec((K, N), lambda s, b: (0, 0)),                      # weight, resident
            pl.BlockSpec((tr, N), lambda s, b: (s, 0)),                     # bias+enc rows
        ],
        out_specs=pl.BlockSpec((pl.Squeezed(), tr, N), lambda s, b: (b, s, 0)),
        compiler_params=pltpu.CompilerParams(
            dimension_semantics=("parallel", "parallel"),
        ),
    )(x_k, w_k, e_k)

    return out.reshape(B, S, D) if P > 1 else out


if __name__ == "__main__":
    # Shapes consistent with the module defaults:
    #   in_features=6, d_model=16, max_len=300; batch=2, seq=8.
    B, S, F, D, MAX_LEN = 2, 8, 6, 16, 300

    key = jax.random.PRNGKey(0)
    kx, kw, kb = jax.random.split(key, 3)
    x = jax.random.normal(kx, (B, S, F), dtype=jnp.float32)
    weight = 0.1 * jax.random.normal(kw, (D, F), dtype=jnp.float32)   # nn.Linear weight (out, in)
    bias = 0.1 * jax.random.normal(kb, (D,), dtype=jnp.float32)
    encoding = make_sinusoidal_encoding(D, MAX_LEN)

    def ref_fn(x_, s_):
        return (
            jnp.einsum("bsf,df->bsd", x_, weight, precision=jax.lax.Precision.HIGHEST)
            + bias[None, None, :]
            + encoding[:s_][None, :, :]
        )

    # 1) Module-default shapes (lane-dense packed path).
    out = jax.block_until_ready(linear_positional_encoder(x, weight, bias, encoding))
    assert out.shape == (B, S, D)
    assert jnp.allclose(out, ref_fn(x, S), atol=2e-2, rtol=2e-2), "mismatch (default shapes)"

    # 2) Multi-tile pipelined packed path (enc/weight reuse across the batch axis).
    S2 = 128
    x2 = jax.random.normal(jax.random.PRNGKey(1), (B, S2, F), dtype=jnp.float32)
    out2 = jax.block_until_ready(
        linear_positional_encoder(x2, weight, bias, encoding, row_tile=8)
    )
    assert jnp.allclose(out2, ref_fn(x2, S2), atol=2e-2, rtol=2e-2), "mismatch (multi-tile)"

    # 3) Sequence length not a multiple of 8 -> plain (unpacked) path, no padding.
    S3 = 12
    x3 = jax.random.normal(jax.random.PRNGKey(2), (B, S3, F), dtype=jnp.float32)
    out3 = jax.block_until_ready(linear_positional_encoder(x3, weight, bias, encoding))
    assert jnp.allclose(out3, ref_fn(x3, S3), atol=2e-2, rtol=2e-2), "mismatch (plain path)"

    print("KERNEL_OK")
</pallas_src>

<mosaic_0001>
module attributes {stable_mosaic.version = 11 : i64} {
  func.func @_fused_linear_posenc_kernel(%arg0: i32, %arg1: i32, %arg2: memref<1x1x48xf32, #tpu.memory_space<vmem>>, %arg3: memref<48x128xf32, #tpu.memory_space<vmem>>, %arg4: memref<1x128xf32, #tpu.memory_space<vmem>>, %arg5: memref<1x1x128xf32, #tpu.memory_space<vmem>>) attributes {dimension_semantics = [#tpu.dimension_semantics<parallel>, #tpu.dimension_semantics<parallel>], iteration_bounds = array<i64: 1, 2>, scalar_prefetch = 0 : i64, scratch_operands = 0 : i64, tpu.core_type = #tpu.core_type<tc>, window_params = [{transform_indices = @transform_0, window_bounds = array<i64: 1, 1, 48>}, {pipeline_mode = #tpu.pipeline_mode<synchronous>, transform_indices = @transform_1, window_bounds = array<i64: 48, 128>}, {transform_indices = @transform_2, window_bounds = array<i64: 1, 128>}, {transform_indices = @transform_3, window_bounds = array<i64: 1, 1, 128>}]} {
    %c0 = arith.constant 0 : index
    %c0_0 = arith.constant 0 : index
    %c0_1 = arith.constant 0 : index
    %0 = vector.load %arg2[%c0, %c0_0, %c0_1] : memref<1x1x48xf32, #tpu.memory_space<vmem>>, vector<1x1x48xf32>
    %1 = vector.shape_cast %0 : vector<1x1x48xf32> to vector<1x48xf32>
    %c0_2 = arith.constant 0 : index
    %c0_3 = arith.constant 0 : index
    %2 = vector.load %arg3[%c0_2, %c0_3] : memref<48x128xf32, #tpu.memory_space<vmem>>, vector<48x128xf32>
    %cst = arith.constant dense<0.000000e+00> : vector<1x128xf32>
    %3 = tpu.matmul %1, %2, %cst {dimension_numbers = #tpu.dot_dimension_numbers<[1], [0], [0], [1], [0, 0, 1, 1], [], []>} : vector<1x48xf32>, vector<48x128xf32>, vector<1x128xf32> -> vector<1x128xf32>
    %c0_4 = arith.constant 0 : index
    %c0_5 = arith.constant 0 : index
    %4 = vector.load %arg4[%c0_4, %c0_5] : memref<1x128xf32, #tpu.memory_space<vmem>>, vector<1x128xf32>
    %5 = arith.addf %3, %4 : vector<1x128xf32>
    %c0_6 = arith.constant 0 : index
    %c0_7 = arith.constant 0 : index
    %c0_8 = arith.constant 0 : index
    %6 = vector.load %arg5[%c0_6, %c0_7, %c0_8] : memref<1x1x128xf32, #tpu.memory_space<vmem>>, vector<1x1x128xf32>
    %7 = vector.shape_cast %6 : vector<1x1x128xf32> to vector<1x128xf32>
    %8 = vector.shape_cast %5 : vector<1x128xf32> to vector<1x1x128xf32>
    tpu.vector_store %arg5[%c0_6, %c0_7, %c0_8], %8 {strides = array<i32>} : memref<1x1x128xf32, #tpu.memory_space<vmem>>, vector<1x1x128xf32>,
    return
  }
  func.func @transform_0(%arg0: i32, %arg1: i32) -> (i32, i32, i32) {
    %c0_i32 = arith.constant 0 : i32
    %c0_i32_0 = arith.constant 0 : i32
    return %arg1, %arg0, %c0_i32 : i32, i32, i32
  }
  func.func @transform_1(%arg0: i32, %arg1: i32) -> (i32, i32) {
    %c0_i32 = arith.constant 0 : i32
    %c0_i32_0 = arith.constant 0 : i32
    %c0_i32_1 = arith.constant 0 : i32
    return %c0_i32, %c0_i32_0 : i32, i32
  }
  func.func @transform_2(%arg0: i32, %arg1: i32) -> (i32, i32) {
    %c0_i32 = arith.constant 0 : i32
    %c0_i32_0 = arith.constant 0 : i32
    return %arg0, %c0_i32 : i32, i32
  }
  func.func @transform_3(%arg0: i32, %arg1: i32) -> (i32, i32, i32) {
    %c0_i32 = arith.constant 0 : i32
    %c0_i32_0 = arith.constant 0 : i32
    return %arg1, %arg0, %c0_i32 : i32, i32, i32
  }
}

</mosaic_0001>

<bundles_post_ra>
// kernel: tpu_custom_call.1
= control target key start
LH: loop header
LB: loop body
LE: loop exit
PB: predicated region body
PF: predicated region fallthrough
CT: control target
= control target key end

     0   :  { %8 = vsyncpa [#allocation3], 0  ;;  %s776_s0 = inlined_call_operand.hbm [shape: f32[2,1,48], index: 0, kind: input, shape index: {}]   ;;  %s777_s1 = inlined_call_operand.hbm [shape: f32[48,128], index: 1, kind: input, shape index: {}]   ;;  %s778_s2 = inlined_call_operand.vmem [shape: f32[1,128], index: 2, kind: input, shape index: {}]   ;;  %s779_s3 = inlined_call_operand.hbm [shape: f32[2,1,128], index: 3, kind: output, shape index: {}]  }
   0x1   :  { %10 = vsyncpa [#allocation3 + $0x1], 0 }
   0x2   :  { %11 = vsyncpa [#allocation6], 0 }
   0x3   :  { %12 = vsyncpa [#allocation4], 0 }
   0x4   :  { %14 = vsyncpa [#allocation4 + $0x1], 0  ;;  %s629_s12 = smov 0   ;;  %s631_s13 = smov 0  }
   0x5   :  { %s633_s14 = smov 0   ;;  %s635_s15 = smov 0  }
   0x6   :  { %s637_s16 = smov 0   ;;  %s639_s17 = smov 0  }
   0x7 LB: > { %s372_s18 = sadd.s32 4294967295, %s604_s17   ;;  %p374_p0 = scmp.ge.s32.totalorder %s604_s17, 1  ;;  %s604_s17 = sphi %s639_s17, %s20_s17   ;;  %s600_s16 = sphi %s637_s16, %s790_s16   ;;  %s596_s15 = sphi %s635_s15, %s789_s15   ;;  %s592_s14 = sphi %s633_s14, %s788_s14   ;;  %s588_s13 = sphi %s631_s13, %s787_s13   ;;  %s584_s12 = sphi %s629_s12, %s786_s12  }
   0x8   : > { %p661_p1 = scmp.eq.s32.totalorder %s372_s18, 0  ;;  %p140_p2 = scmp.lt.s32.totalorder %s604_s17, 3 }
   0x9   : > { %s151_s22 = sshll.u32 %s777_s1, 4  ;;  %s606_s24 = smov [#allocation5]   ;;  %s152_s22 = int_to_ptr.hbm [resolvable:$true] %s151_s22 }
   0xa   : > { %p669_p3 = pnand %p374_p0, %p140_p2  ;;  %s153_s25 = sshll.u32 %s606_s24, 4  ;;  %s154_s25 = int_to_ptr.vmem [resolvable:$true] %s153_s25 }
   0xb   : > { %p377_p6 = scmp.ge.s32.totalorder %s604_s17, 2  ;;  %s607_s26 = smov 128  }
   0xc   : > { %p391_p4 = pneg %p669_p3  ;;  %s608_s27 = smov 8  }
   0xd   : > { %s373_s28 = sadd.s32 4294967294, %s604_s17   ;;  %s29_s29 = sadd.s32 1, %s600_s16 }
   0xe   : > { %p392_p5 = pnand %p391_p4, %p661_p1  ;;  %s41_s30 = sadd.s32 1, %s592_s14 }
   0xf   : > { %p30_p7 = scmp.ge.s32.totalorder %s29_s29, 2  ;;  %p48_p8 = scmp.ne.s32.totalorder %s592_s14, %s588_s13 }
  0x10   : > { %394 = dma.hbm_to_vmem [thread:$0]  (!%p392_p5), %s152_s22, 768, %s154_s25, [#allocation6], %s607_s26, %s607_s26, %s608_s27  }
  0x11   : > { %p49_p9 = scmp.eq.s32.totalorder %s604_s17, 0  ;;  %p54_p10 = scmp.ne.s32.totalorder %s588_s13, %s584_s12 }
  0x12   : > { %s792_s29 = smov (%p30_p7, %s29_s29), 0  ;;  %p127_p13 = scmp.eq.s32.totalorder %s372_s18, 1 }
  0x13   : > { %p688_p11 = por %p49_p9, %p48_p8  ;;  %p694_p12 = por %p661_p1, %p54_p10 }
  0x14   : > { %s36_s6 = ssub.s32 %s600_s16, %s792_s29  ;;  %p133_p2 = scmp.eq.s32.totalorder %s373_s28, 1 }
  0x15   : > { %p39_p0 = scmp.eq.s32.totalorder %s36_s6, 0  ;;  %p700_p4 = por %p127_p13, %p48_p8 }
  0x16   : > { %p404_p5 = scmp.lt.s32.totalorder %s604_s17, 2  ;;  %p708_p7 = por %p133_p2, %p54_p10 }
  0x17   : > { %s706_s8 = scalar_select %p39_p0, %s592_s14, %s41_s30  }
  0x18   : > { %s173_s10 = sand.u32 1, %s592_s14   ;;  %s180_s21 = scalar_lea.hbm %s776_s0, %s600_s16 }
  0x19   : > { %s176_s22 = scalar_lea.vmem [#allocation2], %s173_s10  ;;  %s182_s24 = sshll.u32 %s180_s21, 4  ;;  %s183_s24 = int_to_ptr.hbm [resolvable:$true] %s182_s24 }
  0x1a   : > { %s184_s18 = sshll.u32 %s176_s22, 4  ;;  %p396_p8 = pnand %p404_p5, %p688_p11  ;;  %s185_s18 = int_to_ptr.vmem [resolvable:$true] %s184_s18 }
  0x1b   : > { %s174_s25 = scalar_lea.sflag [#allocation3], %s173_s10  ;;  %193 = sbr.rel (%p669_p3) target bundleno = 178 (0xb2), region = 32 }
  0x1c   : > { %398 = dma.hbm_to_vmem [thread:$0]  (!%p396_p8), %s183_s24, 16, %s185_s18, %s174_s25  }
  0x1d   : > { %s722_s26 = sand.u32 (!%p669_p3), 1, %s588_s13  }
  0x1e   : > { %s196_s27 = scalar_lea.sflag (!%p669_p3), [#allocation3], %s722_s26  ;;  %s198_s28 = scalar_lea.vmem (!%p669_p3), [#allocation2], %s722_s26 }
  0x20   : > { %571 = dma.done.wait (%p694_p12), %s196_s27, 16  }
  0x21   : > { %573 = vsyncadd (%p694_p12), %s196_s27, 4294967280 }
  0x22   : > { %575 = dma.done.wait (%p661_p1), [#allocation6], 768  }
  0x23   : > { %577 = vsyncadd (%p661_p1), [#allocation6], 4294966528  ;;  %v237_v0 = vld [vmem:[#allocation5 + $0x28] sm:$0xff]  ;;  %v236_v1 = vld [vmem:[#allocation5 + $0x20] sm:$0xff]  ;;  %vm239_vm0 = vcmask 392192   ;;  %s274_s30 = scalar_lea.hbm %s779_s3, %s596_s15  ;;  %s227_s6 = scalar_lea.vmem [#allocation7], %s722_s26 }
  0x24   : > { %253 = vmatpush.msra.mxu0 %v237_v0  ;;  %v235_v2 = vld [vmem:[#allocation5 + $0x18] sm:$0xff]  ;;  %v234_v3 = vld [vmem:[#allocation5 + $0x10] sm:$0xff]  ;;  %v233_v4 = vld [vmem:[#allocation5 + $0x8] sm:$0xff]  ;;  %s276_s10 = sshll.u32 %s227_s6, 4  ;;  %s278_s11 = sshll.u32 %s274_s30, 4  ;;  %s277_s10 = int_to_ptr.vmem [resolvable:$true] %s276_s10  ;;  %s279_s11 = int_to_ptr.hbm [resolvable:$true] %s278_s11 }
  0x25   : > { %v232_v5 = vld [vmem:[#allocation5] sm:$0xff]  ;;  %v231_v6 = vld [vmem:[%s198_s28] sm:$0x1]  ;;  %s265_s20 = scalar_lea.sflag [#allocation4], %s722_s26  ;;  %s532_s21 = sshra.s32 %s279_s11, 4  ;;  %s533_s21 = int_to_ptr.hbm [resolvable:$true] %s532_s21 }
  0x26   : > { %254 = vmatpush.msra.mxu0 %v236_v1  ;;  %v238_v7 = vld [vmem:[%s778_s2] sm:$0x1]  ;;  %s534_s22 = scalar_lea.hbm %s533_s21, 1  ;;  %s538_s24 = scalar_lea.hbm %s779_s3, 2 }
  0x27   : > { %p535_p1 = scmp.ne.s32.totalorder %s533_s21, %s534_s22  ;;  %p539_p10 = scmp.lt.s32.totalorder %s533_s21, %s779_s3 }
  0x28   : > { %255 = vmatpush.msra.mxu0 %v235_v2  ;;  %p540_p11 = scmp.lt.s32.totalorder %s538_s24, %s534_s22 }
  0x29   : > { %p536_p3 = pnand %p535_p1, %p700_p4 }
  0x2a   : > { %256 = vmatpush.msra.mxu0 %v234_v3  ;;  %p541_p12 = por %p540_p11, %p539_p10 }
  0x2b   : > { %p537_p9 = pneg %p536_p3 }
  0x2c   : > { %257 = vmatpush.msra.mxu0 %v233_v4 }
  0x2d   : > { %p542_p13 = pnand %p541_p12, %p537_p9 }
  0x2e   : > { %258 = vmatpush.msra.mxu0 %v232_v5 }
  0x2f   : > { %380 = vmatmul.msk.f32.vlgmr.msra.gmra.mxu0 %vm239_vm0, %v231_v6 }
  0xac   : > { %v260_v8 = vpop.f32.mrf.mxu0 }
  0xad   : > { %v261_v9 = vadd.f32 %v260_v8, %v238_v7 }
  0xaf   : > { %263 = vst [vmem:[%s227_s6] sm:$0x1] %v261_v9 }
  0xb0   : > { %545 = shalt.err (!%p542_p13)
}
  0xb1   : > { %389 = dma.vmem_to_hbm [thread:$0]  (%p700_p4), %s277_s10, 16, %s279_s11, %s265_s20  }
  0xb2 PF: > { %s290_s26 = sand.u32 1, %s584_s12   ;;  %p400_p0 = pnand %p377_p6, %p708_p7 }
  0xb3   : > { %s291_s28 = scalar_lea.sflag [#allocation4], %s290_s26 }
  0xb4   : > { %p401_p2 = pneg %p400_p0 }
  0xb6   : > { %579 = dma.done.wait (%p401_p2), %s291_s28, 16  }
  0xb7   : > { %581 = vsyncadd (%p401_p2), %s291_s28, 4294967280  ;;  %s20_s17 = sadd.s32 1, %s604_s17   ;;  %s786_s12 = smov %s588_s13 }
  0xb8   : > { %p17_p5 = scmp.ge.s32.totalorder %s20_s17, 4   ;;  %s787_s13 = smov %s592_s14 }
  0xb9   : > { %s788_s14 = smov %s706_s8  ;;  %s789_s15 = smov %s600_s16 }
  0xba   : > { %s790_s16 = smov %s792_s29  ;;  %19 = sbr.rel (!%p17_p5) target bundleno = 7 (0x7), region = 84 }
  0xbf   :  { %296 = vsyncpa [#allocation3], 1 }
  0xc0   :  { %298 = vsyncpa [#allocation3 + $0x1], 1 }
  0xc1   :  { %299 = vsyncpa [#allocation6], 1 }
  0xc2   :  { %300 = vsyncpa [#allocation4], 1 }
  0xc3   :  { %302 = vsyncpa [#allocation4 + $0x1], 1 }

</bundles_post_ra>
